<compile_context>
chip_gen: v7x
topology: tpu7x:2x2x1
jax: 0.10.0
libtpu: 0.0.40
codegen_flags: <defaults>
</compile_context>

<pallas_src>
import jax
import jax.numpy as jnp
from jax.experimental import pallas as pl
from jax.experimental.pallas import tpu as pltpu

# Small, TPU-tile-friendly shapes.
B = 2        # graphs per batch (grid axis, "parallel")
N = 128      # n_nodes
FEAT = 64    # feat_dim
H1 = 64      # hidden1
H2 = 32      # hidden2
H2_PAD = 128 # lane-dense padded output width


def ecr_fused_kernel(w_ref, adjs_ref, x_ref, w1_ref, w2_ref, out_ref):
    """Fused per-graph step: weighted adjacency combine -> 2-layer GCN.

    w_ref    : SMEM (4,) f32        softmax'd mixing weights
    adjs_ref : VMEM (4, N, N) bf16  (batch dim squeezed by BlockSpec)
    x_ref    : VMEM (N, FEAT) f32
    w1_ref   : VMEM (FEAT, H1) f32
    w2_ref   : VMEM (H1, H2_PAD) f32  (zero-padded columns -> lane-dense output)
    out_ref  : VMEM (N, H2_PAD) f32
    """
    # comb_adj = sum_i softmax(w)[i] * adjs[i]
    # Sequential f32 accumulate on the VPU: keeps at most ~2 live (N,N) f32
    # temporaries (vs 3-4 for the flat 4-term expression) -> no vreg spills.
    comb = w_ref[0] * adjs_ref[0].astype(jnp.float32)
    comb = comb + w_ref[1] * adjs_ref[1].astype(jnp.float32)
    comb = comb + w_ref[2] * adjs_ref[2].astype(jnp.float32)
    comb = comb + w_ref[3] * adjs_ref[3].astype(jnp.float32)
    # Single downcast: bf16 is the native MXU operand path on all generations.
    comb_bf = comb.astype(jnp.bfloat16)                           # (N, N) bf16

    # GCN layer 1 (canonical spmm order): H1 = relu(A @ (X @ W1))
    xw1 = jnp.dot(x_ref[...], w1_ref[...],
                  preferred_element_type=jnp.float32)             # (N, H1) f32
    h1 = jnp.maximum(
        jnp.dot(comb_bf, xw1.astype(jnp.bfloat16),
                preferred_element_type=jnp.float32),
        0.0)                                                      # (N, H1) f32

    # GCN layer 2: out = A @ (H1 @ W2_padded)   (lane-dense 128-wide result)
    h1w2 = jnp.dot(h1, w2_ref[...],
                   preferred_element_type=jnp.float32)            # (N, H2_PAD) f32
    out_ref[...] = jnp.dot(comb_bf, h1w2.astype(jnp.bfloat16),
                           preferred_element_type=jnp.float32)


def ecr_forward(w_adj, adjs, features, w1, w2):
    """adjs: (B, 4, N, N) bf16; features: (B, N, F) f32; w1: (F, H1); w2: (H1, H2)."""
    b, _, n, _ = adjs.shape
    feat = features.shape[-1]
    hid1 = w1.shape[1]
    h2 = w2.shape[1]

    # nn.Softmax(dim=0) over the 4 mixing logits — 4 scalars, done once in the wrapper.
    w = jax.nn.softmax(w_adj).astype(jnp.float32)

    # Lane-dense output: zero-pad W2 columns to a multiple of 128 so the final A-dot
    # and the output store use full lanes (unmasked vst); slice back outside.
    h2_pad = max(128, ((h2 + 127) // 128) * 128)
    w2_padded = jnp.pad(w2, ((0, 0), (0, h2_pad - h2)))

    out_padded = pl.pallas_call(
        ecr_fused_kernel,
        out_shape=jax.ShapeDtypeStruct((b, n, h2_pad), jnp.float32),
        grid=(b,),
        in_specs=[
            pl.BlockSpec(memory_space=pltpu.MemorySpace.SMEM),          # (4,) weights
            pl.BlockSpec((None, 4, n, n), lambda i: (i, 0, 0, 0)),      # this graph's 4 adjs
            pl.BlockSpec((None, n, feat), lambda i: (i, 0, 0)),         # this graph's features
            pl.BlockSpec((feat, hid1), lambda i: (0, 0)),               # W1 (reused)
            pl.BlockSpec((hid1, h2_pad), lambda i: (0, 0)),             # W2 padded (reused)
        ],
        out_specs=pl.BlockSpec((None, n, h2_pad), lambda i: (i, 0, 0)),
        compiler_params=pltpu.CompilerParams(
            dimension_semantics=("parallel",)),                         # megacore-shardable
    )(w, adjs, features, w1, w2_padded)

    return out_padded[..., :h2]


def ecr_reference(w_adj, adjs, features, w1, w2):
    w = jax.nn.softmax(w_adj)
    comb = jnp.einsum("k,bkij->bij", w, adjs.astype(jnp.float32))
    h1 = jnp.maximum(jnp.einsum("bij,bjh->bih", comb, features @ w1), 0.0)
    return jnp.einsum("bij,bjh->bih", comb, h1 @ w2)


def make_inputs(key):
    k_adj, k_x, k_w1, k_w2 = jax.random.split(key, 4)
    # B x 4 deterministic symmetric adjacency matrices (+ self loops), like rand_init.
    raw = jax.random.uniform(k_adj, (B, 4, N, N))
    mats = jnp.where(raw < 0.1, 1.0, 0.0) + jnp.eye(N)[None, None]
    adjs = (mats + jnp.transpose(mats, (0, 1, 3, 2))) / 2.0
    # Values in {0, 0.5, 1, 1.5, 2} are exactly representable in bf16.
    adjs = adjs.astype(jnp.bfloat16)

    features = jax.random.normal(k_x, (B, N, FEAT), dtype=jnp.float32)

    # w_adj initialized to zeros exactly as in the PyTorch module.
    w_adj = jnp.zeros((4,), dtype=jnp.float32)

    # Deterministic GCN weights (glorot-ish scaling).
    w1 = jax.random.normal(k_w1, (FEAT, H1), dtype=jnp.float32) / jnp.sqrt(FEAT)
    w2 = jax.random.normal(k_w2, (H1, H2), dtype=jnp.float32) / jnp.sqrt(H1)
    return w_adj, adjs, features, w1, w2


if __name__ == "__main__":
    key = jax.random.PRNGKey(0)
    w_adj, adjs, features, w1, w2 = make_inputs(key)

    out = ecr_forward(w_adj, adjs, features, w1, w2)
    out = jax.block_until_ready(out)

    ref = ecr_reference(w_adj, adjs, features, w1, w2)
    assert out.shape == (B, N, H2), out.shape
    max_err = float(jnp.max(jnp.abs(out - ref)))
    # bf16 MXU operands (comb / xw1 / h1w2) -> ~1e-2 relative tolerance.
    assert jnp.allclose(out, ref, atol=5e-2, rtol=2e-2), max_err

    print("KERNEL_OK")
</pallas_src>

<mosaic_0001>
module attributes {stable_mosaic.version = 11 : i64} {
  func.func @ecr_fused_kernel(%arg0: i32, %arg1: memref<4xf32, #tpu.memory_space<smem>>, %arg2: memref<1x4x128x128xbf16, #tpu.memory_space<vmem>>, %arg3: memref<1x128x64xf32, #tpu.memory_space<vmem>>, %arg4: memref<64x64xf32, #tpu.memory_space<vmem>>, %arg5: memref<64x128xf32, #tpu.memory_space<vmem>>, %arg6: memref<1x128x128xf32, #tpu.memory_space<vmem>>) attributes {dimension_semantics = [#tpu.dimension_semantics<parallel>], iteration_bounds = array<i64: 2>, scalar_prefetch = 0 : i64, scratch_operands = 0 : i64, tpu.core_type = #tpu.core_type<tc>, window_params = [{transform_indices = @transform_0, window_bounds = array<i64: 4>}, {transform_indices = @transform_1, window_bounds = array<i64: 1, 4, 128, 128>}, {transform_indices = @transform_2, window_bounds = array<i64: 1, 128, 64>}, {pipeline_mode = #tpu.pipeline_mode<synchronous>, transform_indices = @transform_3, window_bounds = array<i64: 64, 64>}, {pipeline_mode = #tpu.pipeline_mode<synchronous>, transform_indices = @transform_4, window_bounds = array<i64: 64, 128>}, {transform_indices = @transform_5, window_bounds = array<i64: 1, 128, 128>}]} {
    %c0 = arith.constant 0 : index
    %0 = memref.load %arg1[%c0] : memref<4xf32, #tpu.memory_space<smem>>
    %c0_0 = arith.constant 0 : index
    %c0_1 = arith.constant 0 : index
    %c0_2 = arith.constant 0 : index
    %c0_3 = arith.constant 0 : index
    %1 = vector.load %arg2[%c0_0, %c0_1, %c0_2, %c0_3] : memref<1x4x128x128xbf16, #tpu.memory_space<vmem>>, vector<1x1x128x128xbf16>
    %2 = vector.shape_cast %1 : vector<1x1x128x128xbf16> to vector<128x128xbf16>
    %3 = arith.extf %2 : vector<128x128xbf16> to vector<128x128xf32>
    %4 = vector.broadcast %0 : f32 to vector<128x128xf32>
    %5 = arith.mulf %4, %3 : vector<128x128xf32>
    %c1 = arith.constant 1 : index
    %6 = memref.load %arg1[%c1] : memref<4xf32, #tpu.memory_space<smem>>
    %c0_4 = arith.constant 0 : index
    %c1_5 = arith.constant 1 : index
    %c0_6 = arith.constant 0 : index
    %c0_7 = arith.constant 0 : index
    %7 = vector.load %arg2[%c0_4, %c1_5, %c0_6, %c0_7] : memref<1x4x128x128xbf16, #tpu.memory_space<vmem>>, vector<1x1x128x128xbf16>
    %8 = vector.shape_cast %7 : vector<1x1x128x128xbf16> to vector<128x128xbf16>
    %9 = arith.extf %8 : vector<128x128xbf16> to vector<128x128xf32>
    %10 = vector.broadcast %6 : f32 to vector<128x128xf32>
    %11 = arith.mulf %10, %9 : vector<128x128xf32>
    %12 = arith.addf %5, %11 : vector<128x128xf32>
    %c2 = arith.constant 2 : index
    %13 = memref.load %arg1[%c2] : memref<4xf32, #tpu.memory_space<smem>>
    %c0_8 = arith.constant 0 : index
    %c2_9 = arith.constant 2 : index
    %c0_10 = arith.constant 0 : index
    %c0_11 = arith.constant 0 : index
    %14 = vector.load %arg2[%c0_8, %c2_9, %c0_10, %c0_11] : memref<1x4x128x128xbf16, #tpu.memory_space<vmem>>, vector<1x1x128x128xbf16>
    %15 = vector.shape_cast %14 : vector<1x1x128x128xbf16> to vector<128x128xbf16>
    %16 = arith.extf %15 : vector<128x128xbf16> to vector<128x128xf32>
    %17 = vector.broadcast %13 : f32 to vector<128x128xf32>
    %18 = arith.mulf %17, %16 : vector<128x128xf32>
    %19 = arith.addf %12, %18 : vector<128x128xf32>
    %c3 = arith.constant 3 : index
    %20 = memref.load %arg1[%c3] : memref<4xf32, #tpu.memory_space<smem>>
    %c0_12 = arith.constant 0 : index
    %c3_13 = arith.constant 3 : index
    %c0_14 = arith.constant 0 : index
    %c0_15 = arith.constant 0 : index
    %21 = vector.load %arg2[%c0_12, %c3_13, %c0_14, %c0_15] : memref<1x4x128x128xbf16, #tpu.memory_space<vmem>>, vector<1x1x128x128xbf16>
    %22 = vector.shape_cast %21 : vector<1x1x128x128xbf16> to vector<128x128xbf16>
    %23 = arith.extf %22 : vector<128x128xbf16> to vector<128x128xf32>
    %24 = vector.broadcast %20 : f32 to vector<128x128xf32>
    %25 = arith.mulf %24, %23 : vector<128x128xf32>
    %26 = arith.addf %19, %25 : vector<128x128xf32>
    %27 = arith.truncf %26 : vector<128x128xf32> to vector<128x128xbf16>
    %c0_16 = arith.constant 0 : index
    %c0_17 = arith.constant 0 : index
    %c0_18 = arith.constant 0 : index
    %28 = vector.load %arg3[%c0_16, %c0_17, %c0_18] : memref<1x128x64xf32, #tpu.memory_space<vmem>>, vector<1x128x64xf32>
    %29 = vector.shape_cast %28 : vector<1x128x64xf32> to vector<128x64xf32>
    %c0_19 = arith.constant 0 : index
    %c0_20 = arith.constant 0 : index
    %30 = vector.load %arg4[%c0_19, %c0_20] : memref<64x64xf32, #tpu.memory_space<vmem>>, vector<64x64xf32>
    %cst = arith.constant dense<0.000000e+00> : vector<128x64xf32>
    %31 = tpu.matmul %29, %30, %cst {dimension_numbers = #tpu.dot_dimension_numbers<[1], [0], [0], [1], [0, 0, 1, 1], [], []>} : vector<128x64xf32>, vector<64x64xf32>, vector<128x64xf32> -> vector<128x64xf32>
    %32 = arith.truncf %31 : vector<128x64xf32> to vector<128x64xbf16>
    %cst_21 = arith.constant dense<0.000000e+00> : vector<128x64xf32>
    %33 = tpu.matmul %27, %32, %cst_21 {dimension_numbers = #tpu.dot_dimension_numbers<[1], [0], [0], [1], [0, 0, 1, 1], [], []>} : vector<128x128xbf16>, vector<128x64xbf16>, vector<128x64xf32> -> vector<128x64xf32>
    %cst_22 = arith.constant 0.000000e+00 : f32
    %34 = vector.broadcast %cst_22 : f32 to vector<128x64xf32>
    %35 = arith.maximumf %33, %34 : vector<128x64xf32>
    %c0_23 = arith.constant 0 : index
    %c0_24 = arith.constant 0 : index
    %36 = vector.load %arg5[%c0_23, %c0_24] : memref<64x128xf32, #tpu.memory_space<vmem>>, vector<64x128xf32>
    %cst_25 = arith.constant dense<0.000000e+00> : vector<128x128xf32>
    %37 = tpu.matmul %35, %36, %cst_25 {dimension_numbers = #tpu.dot_dimension_numbers<[1], [0], [0], [1], [0, 0, 1, 1], [], []>} : vector<128x64xf32>, vector<64x128xf32>, vector<128x128xf32> -> vector<128x128xf32>
    %38 = arith.truncf %37 : vector<128x128xf32> to vector<128x128xbf16>
    %cst_26 = arith.constant dense<0.000000e+00> : vector<128x128xf32>
    %39 = tpu.matmul %27, %38, %cst_26 {dimension_numbers = #tpu.dot_dimension_numbers<[1], [0], [0], [1], [0, 0, 1, 1], [], []>} : vector<128x128xbf16>, vector<128x128xbf16>, vector<128x128xf32> -> vector<128x128xf32>
    %c0_27 = arith.constant 0 : index
    %c0_28 = arith.constant 0 : index
    %c0_29 = arith.constant 0 : index
    %40 = vector.load %arg6[%c0_27, %c0_28, %c0_29] : memref<1x128x128xf32, #tpu.memory_space<vmem>>, vector<1x128x128xf32>
    %41 = vector.shape_cast %40 : vector<1x128x128xf32> to vector<128x128xf32>
    %42 = vector.shape_cast %39 : vector<128x128xf32> to vector<1x128x128xf32>
    tpu.vector_store %arg6[%c0_27, %c0_28, %c0_29], %42 {strides = array<i32>} : memref<1x128x128xf32, #tpu.memory_space<vmem>>, vector<1x128x128xf32>,
    return
  }
  func.func @transform_0(%arg0: i32) -> i32 {
    %c0_i32 = arith.constant 0 : i32
    %c0_i32_0 = arith.constant 0 : i32
    return %c0_i32 : i32
  }
  func.func @transform_1(%arg0: i32) -> (i32, i32, i32, i32) {
    %c0_i32 = arith.constant 0 : i32
    %c0_i32_0 = arith.constant 0 : i32
    %c0_i32_1 = arith.constant 0 : i32
    %c0_i32_2 = arith.constant 0 : i32
    return %arg0, %c0_i32, %c0_i32_0, %c0_i32_1 : i32, i32, i32, i32
  }
  func.func @transform_2(%arg0: i32) -> (i32, i32, i32) {
    %c0_i32 = arith.constant 0 : i32
    %c0_i32_0 = arith.constant 0 : i32
    %c0_i32_1 = arith.constant 0 : i32
    return %arg0, %c0_i32, %c0_i32_0 : i32, i32, i32
  }
  func.func @transform_3(%arg0: i32) -> (i32, i32) {
    %c0_i32 = arith.constant 0 : i32
    %c0_i32_0 = arith.constant 0 : i32
    %c0_i32_1 = arith.constant 0 : i32
    return %c0_i32, %c0_i32_0 : i32, i32
  }
  func.func @transform_4(%arg0: i32) -> (i32, i32) {
    %c0_i32 = arith.constant 0 : i32
    %c0_i32_0 = arith.constant 0 : i32
    %c0_i32_1 = arith.constant 0 : i32
    return %c0_i32, %c0_i32_0 : i32, i32
  }
  func.func @transform_5(%arg0: i32) -> (i32, i32, i32) {
    %c0_i32 = arith.constant 0 : i32
    %c0_i32_0 = arith.constant 0 : i32
    %c0_i32_1 = arith.constant 0 : i32
    return %arg0, %c0_i32, %c0_i32_0 : i32, i32, i32
  }
}

</mosaic_0001>

<bundles_post_ra>
// kernel: tpu_custom_call.1
= control target key start
LH: loop header
LB: loop body
LE: loop exit
PB: predicated region body
PF: predicated region fallthrough
CT: control target
= control target key end

     0   :  { %10 = vsyncpa [#allocation5], 0  ;;  %s2509_s0 = inlined_call_operand.vmem [shape: f32[4], index: 0, kind: input, shape index: {}]   ;;  %s2510_s1 = inlined_call_operand.hbm [shape: bf16[2,4,128,128], index: 1, kind: input, shape index: {}]   ;;  %s2511_s2 = inlined_call_operand.vmem [shape: f32[2,128,64], index: 2, kind: input, shape index: {}]   ;;  %s2512_s3 = inlined_call_operand.vmem [shape: f32[64,64], index: 3, kind: input, shape index: {}]   ;;  %s2513_s4 = inlined_call_operand.vmem [shape: f32[64,128], index: 4, kind: input, shape index: {}]   ;;  %s2514_s5 = inlined_call_operand.hbm [shape: f32[2,128,128], index: 5, kind: output, shape index: {}]  }
   0x1   :  { %11 = vsyncpa [#allocation3], 0 }
   0x2   :  { %13 = vsyncpa [#allocation3 + $0x1], 0 }
   0x3   :  { %14 = vsyncpa [#allocation4], 0 }
   0x4   :  { %16 = vsyncpa [#allocation4 + $0x1], 0  ;;  %s2059_s18 = smov 0   ;;  %s2061_s19 = smov 0  }
   0x5   :  { %s2063_s20 = smov 0   ;;  %s2065_s21 = smov 0  }
   0x6 LB: > { %s2080_s22 = sadd.s32 4294967295, %s2020_s21   ;;  %s1309_s23 = sadd.s32 4294967294, %s2020_s21   ;;  %s2020_s21 = sphi %s2065_s21, %s2534_s21   ;;  %s2016_s20 = sphi %s2063_s20, %s2533_s20   ;;  %s2012_s19 = sphi %s2061_s19, %s2532_s19   ;;  %s2008_s18 = sphi %s2059_s18, %s2531_s18  }
   0x7   : > { %s2084_s24 = sadd.s32 1, %s2020_s21   ;;  %s50_s25 = sadd.s32 1, %s2016_s20 }
   0x8   : > { %s47_s26 = ssub.s32 %s2020_s21, %s2084_s24  ;;  %p57_p0 = scmp.ne.s32.totalorder %s2016_s20, %s2012_s19 }
   0x9   : > { %p48_p1 = scmp.eq.s32.totalorder %s47_s26, 0  ;;  %p58_p2 = scmp.eq.s32.totalorder %s2020_s21, 0 }
   0xa   : > { %p63_p3 = scmp.ne.s32.totalorder %s2012_s19, %s2008_s18  ;;  %p2516_p4 = scmp.eq.s32.totalorder %s2080_s22, 0 }
   0xb   : > { %s2096_s27 = scalar_select %p48_p1, %s2016_s20, %s50_s25  }
   0xc   : > { %p2098_p5 = por %p58_p2, %p57_p0  ;;  %p2104_p6 = por %p2516_p4, %p63_p3 }
   0xd   : > { %p155_p7 = scmp.eq.s32.totalorder %s2080_s22, 1  ;;  %p161_p8 = scmp.eq.s32.totalorder %s1309_s23, 1 }
   0xe   : > { %s2519_s29 = scalar_select %p2104_p6, 1, 0 }
   0xf   : > { %p1310_p9 = scmp.ge.s32.totalorder %s2020_s21, 1  ;;  %p168_p10 = scmp.lt.s32.totalorder %s2020_s21, 3 }
  0x10   : > { %p2111_p11 = por %p155_p7, %p57_p0  ;;  %p2115_p12 = por %p161_p8, %p63_p3 }
  0x11   : > { %p2119_p13 = pnand %p1310_p9, %p168_p10  ;;  %s181_s10 = sshll.u32 %s2509_s0, 4  ;;  %s182_s10 = int_to_ptr.vmem [resolvable:$true] %s181_s10 }
  0x12   : > { %s2520_s30 = scalar_select %p2111_p11, 1, 0 }
  0x13   : > { %s2521_s6 = scalar_select %p2115_p12, 1, 0 }
  0x14   : > { %p1852_p1 = pneg %p2119_p13  ;;  %p1865_p2 = scmp.lt.s32.totalorder %s2020_s21, 2 }
  0x15   : > { %s198_s12 = sand.u32 1, %s2016_s20   ;;  %s1905_s15 = scalar_lea.vmem %s182_s10, 16 }
  0x16   : > { %p2132_p7 = pnand %p1852_p1, %p2516_p4  ;;  %p2139_p3 = pnand %p1865_p2, %p2098_p5 }
  0x17   : > { %s1313_s14 = sshll.u32 %s198_s12, 8  ;;  %p1906_p8 = scmp.ne.s32.totalorder %s182_s10, %s1905_s15 }
  0x18   : > { %p1907_p9 = pneg %p2132_p7  ;;  %p1913_p12 = scmp.lt.s32.totalorder %s182_s10, %s182_s10 }
  0x19   : > { %p1914_p11 = scmp.lt.s32.totalorder %s1905_s15, %s1905_s15 }
  0x1a   : > { %p1908_p10 = pnand %p1907_p9, %p1906_p8 }
  0x1b   : > { %p1915_p1 = por %p1914_p11, %p1913_p12 }
  0x1c   : > { %p1909_p0 = pneg %p1908_p10 }
  0x1e   : > { %p1916_p4 = pnand %p1915_p1, %p1909_p0 }
  0x20   : > { %1919 = shalt.err (!%p1916_p4)
}
  0x21   : > { %s2022_s16 = smov [#allocation2]   ;;  %s1410_s17 = sshll.u32 %s2020_s21, 12 }
  0x22   : > { %1855 = dma.vmem_to_smem (!%p2132_p7), %s182_s10, 16, %s2022_s16, [#allocation5]  }
  0x23   : > { %s202_s23 = scalar_lea.vmem [#allocation6], %s1313_s14  ;;  %s2151_s8 = scalar_lea.hbm %s2510_s1, %s1410_s17 }
  0x24   : > { %s209_s25 = sshll.u32 %s202_s23, 4  ;;  %s2155_s9 = scalar_lea.sflag [#allocation3], %s198_s12  ;;  %s2153_s25 = int_to_ptr.vmem [resolvable:$true] %s209_s25 }
  0x25   : > { %s1920_s11 = scalar_lea.hbm %s2151_s8, 4096  ;;  %p1922_p5 = pneg %p2139_p3 }
  0x26   : > { %p1921_p4 = scmp.ne.s32.totalorder %s2151_s8, %s1920_s11  ;;  %s1925_s15 = scalar_lea.hbm %s2510_s1, 8192 }
  0x27   : > { %p1926_p0 = scmp.lt.u32.totalorder %s2151_s8, %s2510_s1  ;;  %p1927_p2 = scmp.lt.u32.totalorder %s1925_s15, %s1920_s11 }
  0x28   : > { %p1923_p11 = pnand %p1922_p5, %p1921_p4  ;;  %p1929_p8 = scmp.lt.u32.totalorder %s1920_s11, %s2151_s8 }
  0x29   : > { %p1928_p7 = por %p1927_p2, %p1926_p0 }
  0x2a   : > { %p1924_p12 = pneg %p1923_p11 }
  0x2b   : > { %p1930_p9 = por %p1929_p8, %p1928_p7 }
  0x2d   : > { %p1931_p10 = pnand %p1930_p9, %p1924_p12 }
  0x2f   : > { %1934 = shalt.err (!%p1931_p10)
}
  0x30   : > { %s1935_s12 = scalar_lea.vmem %s2153_s25, 4096  ;;  %s2023_s23 = smov [#allocation6]  }
  0x31   : > { %p1936_p1 = scmp.ne.s32.totalorder %s2153_s25, %s1935_s12  ;;  %s1940_s26 = sshll.u32 %s2023_s23, 4  ;;  %s1941_s26 = int_to_ptr.vmem [resolvable:$false] %s1940_s26 }
  0x32   : > { %s1942_s28 = scalar_lea.vmem %s1941_s26, 8192  ;;  %p1943_p6 = scmp.lt.s32.totalorder %s2153_s25, %s1941_s26 }
  0x33   : > { %p1938_p4 = pnand %p1936_p1, %p1922_p5  ;;  %p1944_p0 = scmp.lt.s32.totalorder %s1942_s28, %s1935_s12 }
  0x35   : > { %p1939_p11 = pneg %p1938_p4  ;;  %p1945_p2 = por %p1944_p0, %p1943_p6 }
  0x37   : > { %p1946_p7 = pnand %p1945_p2, %p1939_p11 }
  0x39   : > { %1949 = shalt.err (!%p1946_p7)
}
  0x3a   : > { %s2024_s11 = smov 64   ;;  %s2025_s10 = smov 4  }
  0x3b   : > { %1859 = dma.hbm_to_vmem [thread:$0]  (!%p2139_p3), %s2151_s8, 4096, %s2153_s25, %s2155_s9, %s2024_s11, %s2024_s11, %s2025_s10  }
  0x3c   : > { %229 = sbr.rel (%p2119_p13) target bundleno = 1050 (0x41a), region = 40  ;;  %p2525_p5 = scmp.eq.s32.totalorder (!%p2119_p13), %s2080_s22, 0 }
  0x43   : > { %1995 = dma.done.wait (%p2525_p5), [#allocation5], 16   ;;  %p2526_p12 = pmov %p2525_p5 }
  0x44   : > { %s2190_s14 = sand.u32 1, %s2012_s19   ;;  %p2527_p6 = scmp.ne.s32.totalorder %s2519_s29, 0 }
  0x45   : > { %1997 = vsyncadd (%p2526_p12), [#allocation5], 4294967280  ;;  %s1318_s15 = sshll.u32 %s2190_s14, 8  ;;  %s236_s16 = scalar_lea.sflag [#allocation3], %s2190_s14 }
  0x46   : > { %s2194_s17 = scalar_lea.vmem [#allocation6], %s1318_s15 }
  0x47   : > { %1999 = dma.done.wait (%p2527_p6), %s236_s16, 4096  }
  0x48   : > { %2001 = vsyncadd (%p2527_p6), %s236_s16, 4294963200 }
  0x49   : > { %244 = sfence }
  0x4a   : > { %v553_v0 = vld [vmem:[%s2512_s3] sm:$0xff]  ;;  %v554_v1 = vld [vmem:[%s2512_s3 + $0x8] sm:$0xff]  ;;  %v555_v2 = vld [vmem:[%s2512_s3 + $0x10] sm:$0xff]  ;;  %p272_p13 = scmp.lt.s32.totalorder %s2080_s22, 1  ;;  %vm561_vm0 = vcmask 523264   ;;  %s278_s29 = sld [smem:[#allocation2]] }
  0x4b   : > { %v1796_v3 = vpack.c.bf16 %v554_v1, %v553_v0  ;;  %v556_v4 = vld [vmem:[%s2512_s3 + $0x18] sm:$0xff]  ;;  %v557_v6 = vld [vmem:[%s2512_s3 + $0x20] sm:$0xff]  ;;  %v558_v7 = vld [vmem:[%s2512_s3 + $0x28] sm:$0xff]  ;;  %s1322_s26 = sld [smem:[#allocation2 + $0x1]]  ;;  %s1339_s28 = sld [smem:[#allocation2 + $0x2]] }
  0x4c   : > { %v1800_v5 = vpack.c.bf16 %v556_v4, %v555_v2  ;;  %s273_s15 = scalar_select %p272_p13, %s2080_s22, 1  ;;  %v1804_v8 = vpack.c.bf16 %v558_v7, %v557_v6  ;;  %v559_v9 = vld [vmem:[%s2512_s3 + $0x30] sm:$0xff]  ;;  %v560_v10 = vld [vmem:[%s2512_s3 + $0x38] sm:$0xff]  ;;  %v1414_v28 = vld [vmem:[%s2194_s17] sm:$0xff]  }
  0x4d   : > { %1797 = vmatprep.subr.bf16.mxu0 %v1796_v3  ;;  %v1808_v12 = vpack.c.bf16 %v560_v10, %v559_v9  ;;  %v1548_v29 = vld [vmem:[%s2194_s17 + $0x40] sm:$0xff]   ;;  %s1356_s11 = sld [smem:[#allocation2 + $0x3]]  ;;  %v1415_v30 = vunpack.c.l.bf16 %v1414_v28  ;;  %v1416_v31 = vunpack.c.h.bf16 %v1414_v28  ;;  %v1541_v34 = vld [vmem:[%s2194_s17 + $0x8] sm:$0xff]   ;;  %v1550_v9 = vld [vmem:[%s2194_s17 + $0x50] sm:$0xff]   ;;  %p2528_p8 = scmp.ne.s32.totalorder %s2520_s30, 0 }
  0x4e   : > { %1799 = vmatpush3.bf16.msra.mxu0 %v1796_v3  ;;  %s1411_s16 = sshll.u32 %s273_s15, 7  ;;  %v1447_v32 = vunpack.c.l.bf16 %v1548_v29  ;;  %v1448_v33 = vunpack.c.h.bf16 %v1548_v29  ;;  %v1556_v37 = vld [vmem:[%s2194_s17 + $0x80] sm:$0xff]   ;;  %v1419_v38 = vunpack.c.l.bf16 %v1541_v34  ;;  %v1420_v39 = vunpack.c.h.bf16 %v1541_v34  ;;  %v1549_v49 = vld [vmem:[%s2194_s17 + $0x48] sm:$0xff]   ;;  %s1319_s15 = sshll.u32 %s2190_s14, 7 }
  0x4f   : > { %1801 = vmatprep.subr.bf16.mxu0 %v1800_v5  ;;  %s2223_s25 = scalar_lea.vmem %s2511_s2, %s1411_s16  ;;  %v1479_v44 = vunpack.c.l.bf16 %v1556_v37  ;;  %v1480_v45 = vunpack.c.h.bf16 %v1556_v37  ;;  %v1564_v47 = vld [vmem:[%s2194_s17 + $0xc0] sm:$0xff]   ;;  %v1557_v54 = vld [vmem:[%s2194_s17 + $0x88] sm:$0xff]   ;;  %v1451_v62 = vunpack.c.l.bf16 %v1549_v49  ;;  %v1452_v63 = vunpack.c.h.bf16 %v1549_v49  ;;  %v1559_v49 = vld [vmem:[%s2194_s17 + $0x98] sm:$0xff]   ;;  %s1412_s16 = sshll.u32 %s2080_s22, 11 }
  0x50   : > { %v537_v11 = vld [vmem:[%s2223_s25] sm:$0xff]  ;;  %v538_v13 = vld [vmem:[%s2223_s25 + $0x8] sm:$0xff]  ;;  %v539_v14 = vld [vmem:[%s2223_s25 + $0x10] sm:$0xff]  ;;  %v2266_v35 = vstv %s278_s29  ;;  %v1511_v52 = vunpack.c.l.bf16 %v1564_v47  ;;  %v1512_v53 = vunpack.c.h.bf16 %v1564_v47  ;;  %v1483_v2 = vunpack.c.l.bf16 %v1557_v54  ;;  %s2460_s8 = scalar_lea.hbm %s2514_s5, %s1412_s16  ;;  %s1199_s22 = scalar_lea.sflag [#allocation4], %s2190_s14 }
  0x51   : > { %1668 = vmatprep.mubr.msk.f32.mxu0 %vm561_vm0, %v537_v11  ;;  %v540_v15 = vld [vmem:[%s2223_s25 + $0x18] sm:$0xff]  ;;  %v541_v16 = vld [vmem:[%s2223_s25 + $0x20] sm:$0xff]  ;;  %v542_v17 = vld [vmem:[%s2223_s25 + $0x28] sm:$0xff]  ;;  %v2268_v36 = vstv %s1322_s26  ;;  %v312_v40 = vmul.f32 %v1415_v30, %v2266_v35  ;;  %v313_v41 = vmul.f32 %v1416_v31, %v2266_v35  ;;  %v314_v48 = vmul.f32 %v1419_v38, %v2266_v35  ;;  %s2026_s12 = smov [#allocation7]  }
  0x52   : > { %1803 = vmatpush3.bf16.msra.mxu0 %v1800_v5  ;;  %v543_v18 = vld [vmem:[%s2223_s25 + $0x30] sm:$0xff]  ;;  %v544_v19 = vld [vmem:[%s2223_s25 + $0x38] sm:$0xff]  ;;  %v545_v20 = vld [vmem:[%s2223_s25 + $0x40] sm:$0xff]  ;;  %v363_v42 = vmul.f32 %v1447_v32, %v2268_v36  ;;  %v364_v43 = vmul.f32 %v1448_v33, %v2268_v36  ;;  %v2275_v46 = vstv %s1339_s28  ;;  %v315_v58 = vmul.f32 %v1420_v39, %v2266_v35  ;;  %s1954_s23 = sshll.u32 %s2026_s12, 4  ;;  %s1955_s23 = int_to_ptr.vmem [resolvable:$false] %s1954_s23 }
  0x53   : > { %1805 = vmatprep.subr.bf16.mxu0 %v1804_v8  ;;  %v546_v21 = vld [vmem:[%s2223_s25 + $0x48] sm:$0xff]  ;;  %v547_v22 = vld [vmem:[%s2223_s25 + $0x50] sm:$0xff]  ;;  %v548_v23 = vld [vmem:[%s2223_s25 + $0x58] sm:$0xff]  ;;  %v430_v55 = vmul.f32 %v1479_v44, %v2275_v46  ;;  %v431_v56 = vmul.f32 %v1480_v45, %v2275_v46  ;;  %v2283_v57 = vstv %s1356_s11  ;;  %v1484_v3 = vunpack.c.h.bf16 %v1557_v54  ;;  %s1956_s29 = scalar_lea.vmem %s1955_s23, 4096 }
  0x54   : > { %v549_v24 = vld [vmem:[%s2223_s25 + $0x60] sm:$0xff]  ;;  %v550_v25 = vld [vmem:[%s2223_s25 + $0x68] sm:$0xff]  ;;  %v551_v26 = vld [vmem:[%s2223_s25 + $0x70] sm:$0xff]  ;;  %v379_v50 = vadd.f32 %v363_v42, %v312_v40  ;;  %v380_v51 = vadd.f32 %v364_v43, %v313_v41  ;;  %v497_v60 = vmul.f32 %v1511_v52, %v2283_v57  ;;  %v498_v61 = vmul.f32 %v1512_v53, %v2283_v57 }
  0x55   : > { %v552_v27 = vld [vmem:[%s2223_s25 + $0x78] sm:$0xff]  ;;  %v1565_v59 = vld [vmem:[%s2194_s17 + $0xc8] sm:$0xff]   ;;  %v365_v4 = vmul.f32 %v1451_v62, %v2268_v36  ;;  %v366_v5 = vmul.f32 %v1452_v63, %v2268_v36  ;;  %v1491_v63 = vunpack.c.l.bf16 %v1559_v49 }
  0x56   : > { %1807 = vmatpush3.bf16.msra.mxu0 %v1804_v8  ;;  %v446_v0 = vadd.f32 %v430_v55, %v379_v50  ;;  %v447_v1 = vadd.f32 %v431_v56, %v380_v51  ;;  %v1515_v6 = vunpack.c.l.bf16 %v1565_v59  ;;  %v1516_v7 = vunpack.c.h.bf16 %v1565_v59  ;;  %v1542_v8 = vld [vmem:[%s2194_s17 + $0x10] sm:$0xff]   ;;  %v1543_v32 = vld [vmem:[%s2194_s17 + $0x18] sm:$0xff]  }
  0x57   : > { %1809 = vmatprep.subr.bf16.mxu0 %v1808_v12  ;;  %v1551_v39 = vld [vmem:[%s2194_s17 + $0x58] sm:$0xff]   ;;  %v1427_v47 = vunpack.c.l.bf16 %v1543_v32 }
  0x58   : > { %v513_v10 = vadd.f32 %v497_v60, %v446_v0  ;;  %v514_v11 = vadd.f32 %v498_v61, %v447_v1  ;;  %v1459_v53 = vunpack.c.l.bf16 %v1551_v39  ;;  %v1567_v54 = vld [vmem:[%s2194_s17 + $0xd8] sm:$0xff]   ;;  %v1460_v59 = vunpack.c.h.bf16 %v1551_v39  ;;  %v1544_v60 = vld [vmem:[%s2194_s17 + $0x20] sm:$0xff]  }
  0x59   : > { %v318_v56 = vmul.f32 %v1427_v47, %v2266_v35  ;;  %v1492_v0 = vunpack.c.h.bf16 %v1559_v49 }
  0x5a   : > { %1811 = vmatpush3.bf16.msra.mxu0 %v1808_v12  ;;  %v432_v12 = vmul.f32 %v1483_v2, %v2275_v46  ;;  %v369_v62 = vmul.f32 %v1459_v53, %v2268_v36  ;;  %v370_v2 = vmul.f32 %v1460_v59, %v2268_v36 }
  0x5d   : > { %1669 = vmatmul.mubr.msk.f32.vlgmr.msra.gmra.mrb[0].mxu0 %vm561_vm0, %v538_v13  ;;  %v433_v13 = vmul.f32 %v1484_v3, %v2275_v46  ;;  %v1523_v3 = vunpack.c.l.bf16 %v1567_v54 }
  0x5e   : > { %1671 = vmatprep.mubr.msk.f32.mxu0 %vm561_vm0, %v539_v14  ;;  %v1558_v14 = vld [vmem:[%s2194_s17 + $0x90] sm:$0xff]  }
  0x5f   : > { %v1488_v31 = vunpack.c.h.bf16 %v1558_v14 }
  0x61   : > { %1672 = vmatmul.mubr.msk.f32.gmra.mrb[2].mxu0 %vm561_vm0, %v540_v15  ;;  %v381_v15 = vadd.f32 %v365_v4, %v314_v48  ;;  %v435_v41 = vmul.f32 %v1488_v31, %v2275_v46  ;;  %v1428_v48 = vunpack.c.h.bf16 %v1543_v32  ;;  %v1524_v4 = vunpack.c.h.bf16 %v1567_v54 }
  0x62   : > { %1674 = vmatprep.mubr.msk.f32.mxu0 %vm561_vm0, %v541_v16  ;;  %v382_v16 = vadd.f32 %v366_v5, %v315_v58  ;;  %v1552_v5 = vld [vmem:[%s2194_s17 + $0x60] sm:$0xff]  }
  0x63   : > { %v319_v58 = vmul.f32 %v1428_v48, %v2266_v35  ;;  %v1569_v48 = vld [vmem:[%s2194_s17 + $0xe8] sm:$0xff]  }
  0x65   : > { %1675 = vmatmul.mubr.msk.f32.gmra.mrb[4].mxu0 %vm561_vm0, %v542_v17  ;;  %v499_v17 = vmul.f32 %v1515_v6, %v2283_v57  ;;  %v385_v6 = vadd.f32 %v369_v62, %v318_v56  ;;  %v1531_v62 = vunpack.c.l.bf16 %v1569_v48 }
  0x66   : > { %1677 = vmatprep.mubr.msk.f32.mxu0 %vm561_vm0, %v543_v18  ;;  %v500_v18 = vmul.f32 %v1516_v7, %v2283_v57  ;;  %v436_v7 = vmul.f32 %v1491_v63, %v2275_v46 }
  0x69   : > { %1678 = vmatmul.mubr.msk.f32.gmra.mrb[6].mxu0 %vm561_vm0, %v544_v19  ;;  %v2298_v19 = vpack.c.bf16 %v514_v11, %v513_v10  ;;  %v1560_v10 = vld [vmem:[%s2194_s17 + $0xa0] sm:$0xff]  }
  0x6a   : > { %1680 = vmatprep.mubr.msk.f32.mxu0 %vm561_vm0, %v545_v20  ;;  %v1423_v20 = vunpack.c.l.bf16 %v1542_v8 }
  0x6b   : > { %1708 = vmatprep.mubr.bf16.mxu1 %v2298_v19 }
  0x6c   : > { %v316_v28 = vmul.f32 %v1423_v20, %v2266_v35  ;;  %v1463_v20 = vunpack.c.l.bf16 %v1552_v5 }
  0x6d   : > { %1681 = vmatmul.mubr.msk.f32.gmra.mrb[8].mxu0 %vm561_vm0, %v546_v21  ;;  %v1424_v21 = vunpack.c.h.bf16 %v1542_v8  ;;  %v437_v8 = vmul.f32 %v1492_v0, %v2275_v46 }
  0x6e   : > { %1683 = vmatprep.mubr.msk.f32.mxu0 %vm561_vm0, %v547_v22  ;;  %v1455_v22 = vunpack.c.l.bf16 %v1550_v9 }
  0x6f   : > { %v317_v29 = vmul.f32 %v1424_v21, %v2266_v35 }
  0x70   : > { %v367_v30 = vmul.f32 %v1455_v22, %v2268_v36  ;;  %v1464_v22 = vunpack.c.h.bf16 %v1552_v5 }
  0x71   : > { %1684 = vmatmul.mubr.msk.f32.gmra.mrb[10].mxu0 %vm561_vm0, %v548_v23  ;;  %v448_v23 = vadd.f32 %v432_v12, %v381_v15  ;;  %v386_v12 = vadd.f32 %v370_v2, %v319_v58  ;;  %v1568_v15 = vld [vmem:[%s2194_s17 + $0xe0] sm:$0xff]   ;;  %v1546_v58 = vld [vmem:[%s2194_s17 + $0x30] sm:$0xff]   ;;  %v1532_v2 = vunpack.c.h.bf16 %v1569_v48 }
  0x72   : > { %1686 = vmatprep.mubr.msk.f32.mxu0 %vm561_vm0, %v549_v24  ;;  %v449_v24 = vadd.f32 %v433_v13, %v382_v16  ;;  %v383_v40 = vadd.f32 %v367_v30, %v316_v28  ;;  %v503_v13 = vmul.f32 %v1523_v3, %v2283_v57  ;;  %v452_v16 = vadd.f32 %v436_v7, %v385_v6  ;;  %v1553_v30 = vld [vmem:[%s2194_s17 + $0x68] sm:$0xff]   ;;  %v1554_v3 = vld [vmem:[%s2194_s17 + $0x70] sm:$0xff]  }
  0x73   : > { %v515_v33 = vadd.f32 %v499_v17, %v448_v23  ;;  %v1432_v17 = vunpack.c.h.bf16 %v1544_v60  ;;  %v453_v21 = vadd.f32 %v437_v8, %v386_v12  ;;  %v1495_v23 = vunpack.c.l.bf16 %v1560_v10  ;;  %v1562_v8 = vld [vmem:[%s2194_s17 + $0xb0] sm:$0xff]  }
  0x74   : > { %v516_v34 = vadd.f32 %v500_v18, %v449_v24  ;;  %v1496_v24 = vunpack.c.h.bf16 %v1560_v10  ;;  %v371_v28 = vmul.f32 %v1463_v20, %v2268_v36  ;;  %v372_v32 = vmul.f32 %v1464_v22, %v2268_v36  ;;  %v1547_v20 = vld [vmem:[%s2194_s17 + $0x38] sm:$0xff]  }
  0x75   : > { %1687 = vmatmul.mubr.msk.f32.gmra.mrb[12].mxu0 %vm561_vm0, %v550_v25  ;;  %v1456_v25 = vunpack.c.h.bf16 %v1550_v9  ;;  %v1431_v9 = vunpack.c.l.bf16 %v1544_v60  ;;  %v1467_v47 = vunpack.c.l.bf16 %v1553_v30  ;;  %v507_v6 = vmul.f32 %v1531_v62, %v2283_v57 }
  0x76   : > { %1689 = vmatprep.mubr.msk.f32.mxu0 %vm561_vm0, %v551_v26  ;;  %v1487_v26 = vunpack.c.l.bf16 %v1558_v14  ;;  %v2310_v44 = vpack.c.bf16 %v516_v34, %v515_v33  ;;  %v504_v14 = vmul.f32 %v1524_v4, %v2283_v57  ;;  %v438_v33 = vmul.f32 %v1495_v23, %v2275_v46 }
  0x77   : > { %v368_v37 = vmul.f32 %v1456_v25, %v2268_v36  ;;  %v320_v18 = vmul.f32 %v1431_v9, %v2266_v35  ;;  %v1545_v25 = vld [vmem:[%s2194_s17 + $0x28] sm:$0xff]   ;;  %v439_v34 = vmul.f32 %v1496_v24, %v2275_v46  ;;  %v1439_v7 = vunpack.c.l.bf16 %v1546_v58 }
  0x78   : > { %v434_v38 = vmul.f32 %v1487_v26, %v2275_v46  ;;  %v519_v26 = vadd.f32 %v503_v13, %v452_v16  ;;  %v520_v31 = vadd.f32 %v504_v14, %v453_v21  ;;  %v508_v12 = vmul.f32 %v1532_v2, %v2283_v57  ;;  %v1570_v14 = vld [vmem:[%s2194_s17 + $0xf0] sm:$0xff]  }
  0x79   : > { %1690 = vmatmul.mubr.msk.f32.gmra.mrb[14].mxu0 %vm561_vm0, %v552_v27  ;;  %v1566_v27 = vld [vmem:[%s2194_s17 + $0xd0] sm:$0xff]   ;;  %v384_v45 = vadd.f32 %v368_v37, %v317_v29  ;;  %v1527_v29 = vunpack.c.l.bf16 %v1568_v15  ;;  %v387_v37 = vadd.f32 %v371_v28, %v320_v18  ;;  %v1440_v13 = vunpack.c.h.bf16 %v1546_v58 }
  0x7a   : > { %v1519_v42 = vunpack.c.l.bf16 %v1566_v27  ;;  %v1520_v43 = vunpack.c.h.bf16 %v1566_v27  ;;  %v450_v50 = vadd.f32 %v434_v38, %v383_v40  ;;  %v321_v27 = vmul.f32 %v1432_v17, %v2266_v35 }
  0x7b   : > { %v451_v55 = vadd.f32 %v435_v41, %v384_v45  ;;  %v1528_v38 = vunpack.c.h.bf16 %v1568_v15  ;;  %v505_v39 = vmul.f32 %v1527_v29, %v2283_v57  ;;  %v1435_v40 = vunpack.c.l.bf16 %v1545_v25  ;;  %v1561_v41 = vld [vmem:[%s2194_s17 + $0xa8] sm:$0xff]   ;;  %v1555_v29 = vld [vmem:[%s2194_s17 + $0x78] sm:$0xff]  }
  0x7c   : > { %v501_v51 = vmul.f32 %v1519_v42, %v2283_v57  ;;  %v502_v52 = vmul.f32 %v1520_v43, %v2283_v57  ;;  %v2340_v42 = vpack.c.bf16 %v520_v31, %v519_v26  ;;  %v388_v43 = vadd.f32 %v372_v32, %v321_v27 }
  0x7d   : > { %v1436_v45 = vunpack.c.h.bf16 %v1545_v25  ;;  %v454_v49 = vadd.f32 %v438_v33, %v387_v37  ;;  %v1499_v56 = vunpack.c.l.bf16 %v1561_v41  ;;  %v324_v16 = vmul.f32 %v1439_v7, %v2266_v35 }
  0x7e   : > { %v517_v61 = vadd.f32 %v501_v51, %v450_v50  ;;  %v518_v1 = vadd.f32 %v502_v52, %v451_v55  ;;  %v506_v50 = vmul.f32 %v1528_v38, %v2283_v57  ;;  %v322_v51 = vmul.f32 %v1435_v40, %v2266_v35 }
  0x7f   : > { %v1468_v52 = vunpack.c.h.bf16 %v1553_v30  ;;  %v455_v53 = vadd.f32 %v439_v34, %v388_v43  ;;  %v323_v54 = vmul.f32 %v1436_v45, %v2266_v35  ;;  %v373_v55 = vmul.f32 %v1467_v47, %v2268_v36  ;;  %v1563_v34 = vld [vmem:[%s2194_s17 + $0xb8] sm:$0xff]  }
  0x80   : > { %v2325_v11 = vpack.c.bf16 %v518_v1, %v517_v61  ;;  %v521_v59 = vadd.f32 %v505_v39, %v454_v49  ;;  %v1500_v61 = vunpack.c.h.bf16 %v1561_v41  ;;  %v440_v1 = vmul.f32 %v1499_v56, %v2275_v46  ;;  %v1571_v41 = vld [vmem:[%s2194_s17 + $0xf8] sm:$0xff]   ;;  %s2440_s17 = scalar_lea.vmem [#allocation7], %s1319_s15 }
  0x81   : > { %v374_v60 = vmul.f32 %v1468_v52, %v2268_v36  ;;  %v522_v63 = vadd.f32 %v506_v50, %v455_v53  ;;  %v389_v0 = vadd.f32 %v373_v55, %v322_v51  ;;  %v1471_v17 = vunpack.c.l.bf16 %v1554_v3  ;;  %v876_v53 = vld [vmem:[%s2513_s4] sm:$0xff]  ;;  %s1212_s7 = sshll.u32 %s2440_s17, 4  ;;  %s2462_s7 = int_to_ptr.vmem [resolvable:$true] %s1212_s7 }
  0x82   : > { %v441_v5 = vmul.f32 %v1500_v61, %v2275_v46  ;;  %v1472_v18 = vunpack.c.h.bf16 %v1554_v3  ;;  %v325_v22 = vmul.f32 %v1440_v13, %v2266_v35  ;;  %v1503_v23 = vunpack.c.l.bf16 %v1562_v8  ;;  %v879_v61 = vld [vmem:[%s2513_s4 + $0x18] sm:$0xff]  ;;  %v881_v13 = vld [vmem:[%s2513_s4 + $0x28] sm:$0xff]  ;;  %s1950_s9 = scalar_lea.vmem %s2462_s7, 2048  ;;  %p1957_p1 = scmp.lt.s32.totalorder %s2462_s7, %s1955_s23 }
  0x83   : > { %v390_v4 = vadd.f32 %v374_v60, %v323_v54  ;;  %v2354_v9 = vpack.c.bf16 %v522_v63, %v521_v59  ;;  %v456_v10 = vadd.f32 %v440_v1, %v389_v0  ;;  %v1504_v24 = vunpack.c.h.bf16 %v1562_v8  ;;  %v877_v59 = vld [vmem:[%s2513_s4 + $0x8] sm:$0xff]  ;;  %v878_v60 = vld [vmem:[%s2513_s4 + $0x10] sm:$0xff]  ;;  %p1951_p3 = scmp.ne.s32.totalorder %s2462_s7, %s1950_s9  ;;  %p1958_p4 = scmp.lt.s32.totalorder %s1956_s29, %s1950_s9 }
  0x84   : > { %v375_v26 = vmul.f32 %v1471_v17, %v2268_v36  ;;  %v376_v27 = vmul.f32 %v1472_v18, %v2268_v36  ;;  %v1535_v28 = vunpack.c.l.bf16 %v1570_v14  ;;  %v442_v30 = vmul.f32 %v1503_v23, %v2275_v46  ;;  %v882_v17 = vld [vmem:[%s2513_s4 + $0x30] sm:$0xff] }
  0x85   : > { %v457_v15 = vadd.f32 %v441_v5, %v390_v4  ;;  %v523_v21 = vadd.f32 %v507_v6, %v456_v10  ;;  %v443_v31 = vmul.f32 %v1504_v24, %v2275_v46  ;;  %v1536_v32 = vunpack.c.h.bf16 %v1570_v14  ;;  %p1952_p9 = pnand %p1951_p3, %p2528_p8  ;;  %p1959_p11 = por %p1958_p4, %p1957_p1 }
  0x86   : > { %v1443_v33 = vunpack.c.l.bf16 %v1547_v20  ;;  %v391_v38 = vadd.f32 %v375_v26, %v324_v16  ;;  %v392_v39 = vadd.f32 %v376_v27, %v325_v22  ;;  %v509_v40 = vmul.f32 %v1535_v28, %v2283_v57 }
  0x87   : > { %v524_v25 = vadd.f32 %v508_v12, %v457_v15  ;;  %v510_v43 = vmul.f32 %v1536_v32, %v2283_v57  ;;  %v1444_v45 = vunpack.c.h.bf16 %v1547_v20  ;;  %v1475_v48 = vunpack.c.l.bf16 %v1555_v29  ;;  %p1953_p10 = pneg %p1952_p9 }
  0x88   : > { %v326_v47 = vmul.f32 %v1443_v33, %v2266_v35  ;;  %v458_v49 = vadd.f32 %v442_v30, %v391_v38  ;;  %v459_v50 = vadd.f32 %v443_v31, %v392_v39  ;;  %v1476_v51 = vunpack.c.h.bf16 %v1555_v29 }
  0x89   : > { %v2367_v37 = vpack.c.bf16 %v524_v25, %v523_v21  ;;  %v1507_v52 = vunpack.c.l.bf16 %v1563_v34  ;;  %v327_v54 = vmul.f32 %v1444_v45, %v2266_v35  ;;  %v377_v55 = vmul.f32 %v1475_v48, %v2268_v36  ;;  %p1960_p0 = pnand %p1959_p11, %p1953_p10 }
  0x8a   : > { %v1508_v56 = vunpack.c.h.bf16 %v1563_v34  ;;  %v1539_v58 = vunpack.c.l.bf16 %v1571_v41  ;;  %v525_v62 = vadd.f32 %v509_v40, %v458_v49  ;;  %v526_v63 = vadd.f32 %v510_v43, %v459_v50 }
  0x8b   : > { %v378_v35 = vmul.f32 %v1476_v51, %v2268_v36  ;;  %v444_v0 = vmul.f32 %v1507_v52, %v2275_v46  ;;  %v393_v1 = vadd.f32 %v377_v55, %v326_v47  ;;  %v1540_v3 = vunpack.c.h.bf16 %v1571_v41  ;;  %v880_v36 = vld [vmem:[%s2513_s4 + $0x20] sm:$0xff] }
  0x8c   : > { %v445_v2 = vmul.f32 %v1508_v56, %v2275_v46  ;;  %v511_v4 = vmul.f32 %v1539_v58, %v2283_v57  ;;  %v2391_v5 = vpack.c.bf16 %v526_v63, %v525_v62  ;;  %v1812_v7 = vpack.c.bf16 %v877_v59, %v876_v53 }
  0x8d   : > { %v394_v6 = vadd.f32 %v378_v35, %v327_v54  ;;  %v1816_v8 = vpack.c.bf16 %v879_v61, %v878_v60  ;;  %v460_v10 = vadd.f32 %v444_v0, %v393_v1  ;;  %v512_v12 = vmul.f32 %v1540_v3, %v2283_v57  ;;  %v883_v57 = vld [vmem:[%s2513_s4 + $0x38] sm:$0xff] }
  0x8e   : > { %1813 = vmatprep.subr.bf16.mxu0 %v1812_v7  ;;  %v1820_v16 = vpack.c.bf16 %v881_v13, %v880_v36  ;;  %v1824_v20 = vpack.c.bf16 %v883_v57, %v882_v17 }
  0x8f   : > { %v461_v46 = vadd.f32 %v445_v2, %v394_v6  ;;  %v527_v14 = vadd.f32 %v511_v4, %v460_v10  ;;  %1815 = vmatpush3.bf16.msra.mxu0 %v1812_v7 }
  0x90   : > { %1817 = vmatprep.subr.bf16.mxu0 %v1816_v8 }
  0x91   : > { %v528_v15 = vadd.f32 %v512_v12, %v461_v46 }
  0x93   : > { %v2406_v18 = vpack.c.bf16 %v528_v15, %v527_v14  ;;  %1819 = vmatpush3.bf16.msra.mxu0 %v1816_v8 }
  0x94   : > { %1821 = vmatprep.subr.bf16.mxu0 %v1820_v16 }
  0x97   : > { %1823 = vmatpush3.bf16.msra.mxu0 %v1820_v16 }
  0x98   : > { %1825 = vmatprep.subr.bf16.mxu0 %v1824_v20 }
  0x9b   : > { %1827 = vmatpush3.bf16.msra.mxu0 %v1824_v20 }
 0x130   : > { %v1670_v21 = vpop.f32.mrb[0].mxu0 }
 0x131   : > { %v676_v22 = vpop.f32.mrb[1].mxu0 }
 0x132   : > { %v755_v23 = vpack.c.bf16 %v1670_v21, %v676_v22 }
 0x134   : > { %v1673_v24 = vpop.f32.mrb[2].mxu0  ;;  %1692 = vmatprep.subr.bf16.mxu1 %v755_v23 }
 0x135   : > { %v686_v25 = vpop.f32.mrb[3].mxu0  ;;  %1693 = vmatpush3.bf16.msra.mxu1 %v755_v23 }
 0x136   : > { %v756_v26 = vpack.c.bf16 %v1673_v24, %v686_v25 }
 0x138   : > { %v1676_v27 = vpop.f32.mrb[4].mxu0  ;;  %1694 = vmatprep.subr.bf16.mxu1 %v756_v26 }
 0x139   : > { %v696_v28 = vpop.f32.mrb[5].mxu0  ;;  %1695 = vmatpush3.bf16.msra.mxu1 %v756_v26 }
 0x13a   : > { %v757_v29 = vpack.c.bf16 %v1676_v27, %v696_v28 }
 0x13c   : > { %v1679_v30 = vpop.f32.mrb[6].mxu0  ;;  %1696 = vmatprep.subr.bf16.mxu1 %v757_v29 }
 0x13d   : > { %v706_v31 = vpop.f32.mrb[7].mxu0  ;;  %1697 = vmatpush3.bf16.msra.mxu1 %v757_v29 }
 0x13e   : > { %v758_v32 = vpack.c.bf16 %v1679_v30, %v706_v31 }
 0x140   : > { %v1682_v33 = vpop.f32.mrb[8].mxu0  ;;  %1698 = vmatprep.subr.bf16.mxu1 %v758_v32 }
 0x141   : > { %v716_v34 = vpop.f32.mrb[9].mxu0  ;;  %1699 = vmatpush3.bf16.msra.mxu1 %v758_v32 }
 0x142   : > { %v759_v38 = vpack.c.bf16 %v1682_v33, %v716_v34 }
 0x144   : > { %v1685_v39 = vpop.f32.mrb[10].mxu0  ;;  %1700 = vmatprep.subr.bf16.mxu1 %v759_v38 }
 0x145   : > { %v726_v40 = vpop.f32.mrb[11].mxu0  ;;  %1701 = vmatpush3.bf16.msra.mxu1 %v759_v38 }
 0x146   : > { %v760_v41 = vpack.c.bf16 %v1685_v39, %v726_v40 }
 0x148   : > { %v1688_v43 = vpop.f32.mrb[12].mxu0  ;;  %1702 = vmatprep.subr.bf16.mxu1 %v760_v41 }
 0x149   : > { %v736_v45 = vpop.f32.mrb[13].mxu0  ;;  %1703 = vmatpush3.bf16.msra.mxu1 %v760_v41 }
 0x14a   : > { %v761_v47 = vpack.c.bf16 %v1688_v43, %v736_v45 }
 0x14c   : > { %v1691_v48 = vpop.f32.mrb[14].mxu0  ;;  %1704 = vmatprep.subr.bf16.mxu1 %v761_v47 }
 0x14d   : > { %v746_v49 = vpop.f32.mrb[15].mxu0  ;;  %1705 = vmatpush3.bf16.msra.mxu1 %v761_v47 }
 0x14e   : > { %v762_v50 = vpack.c.bf16 %v1691_v48, %v746_v49 }
 0x150   : > { %1706 = vmatprep.subr.bf16.mxu1 %v762_v50 }
 0x151   : > { %1707 = vmatpush3.bf16.msra.mxu1 %v762_v50 }
 0x154   : > { %1709 = vmatmul.mubr.bf16.vlgmr.msra.gmra.mrb[0].mxu1 %v2310_v44 }
 0x155   : > { %1712 = vmatprep.mubr.bf16.mxu1 %v2325_v11 }
 0x15c   : > { %1713 = vmatmul.mubr.bf16.gmra.mrb[4].mxu1 %v2340_v42 }
 0x15d   : > { %1716 = vmatprep.mubr.bf16.mxu1 %v2354_v9 }
 0x164   : > { %1717 = vmatmul.mubr.bf16.gmra.mrb[8].mxu1 %v2367_v37 }
 0x165   : > { %1720 = vmatprep.mubr.bf16.mxu1 %v2391_v5 }
 0x16c   : > { %1721 = vmatmul.mubr.bf16.gmra.mrb[12].mxu1 %v2406_v18 }
 0x16d   : > { %1784 = vmatprep.mubr.bf16.mxu1 %v2325_v11 }
 0x227   : > { %v1710_v51 = vpop.f32.mrb[0].mxu1 }
 0x228   : > { %v797_v52 = vpop.f32.mrb[1].mxu1  ;;  %v862_v58 = vmax.f32 %v1710_v51, 0.0 }
 0x229   : > { %v860_v53 = vmax.f32 %v797_v52, 0.0  ;;  %v1711_v54 = vpop.f32.mrb[2].mxu1 }
 0x22a   : > { %v800_v55 = vpop.f32.mrb[3].mxu1  ;;  %v863_v59 = vmax.f32 %v1711_v54, 0.0 }
 0x22b   : > { %v861_v56 = vmax.f32 %v800_v55, 0.0  ;;  %1740 = vmatprep.mubr.msk.f32.mxu0 %vm561_vm0, %v860_v53 }
 0x22d   : > { %1741 = vmatmul.mubr.msk.f32.vlgmr.msra.gmra.mrb[16].mxu0 %vm561_vm0, %v861_v56 }
 0x22e   : > { %1743 = vmatprep.mubr.msk.f32.mxu0 %vm561_vm0, %v862_v58 }
 0x22f   : > { %v1714_v60 = vpop.f32.mrb[4].mxu1 }
 0x230   : > { %v813_v61 = vpop.f32.mrb[5].mxu1  ;;  %v866_v0 = vmax.f32 %v1714_v60, 0.0 }
 0x231   : > { %v864_v62 = vmax.f32 %v813_v61, 0.0  ;;  %v1715_v63 = vpop.f32.mrb[6].mxu1  ;;  %1744 = vmatmul.mubr.msk.f32.gmra.mrb[18].mxu0 %vm561_vm0, %v863_v59 }
 0x232   : > { %v816_v11 = vpop.f32.mrb[7].mxu1  ;;  %v867_v1 = vmax.f32 %v1715_v63, 0.0 }
 0x233   : > { %v865_v35 = vmax.f32 %v816_v11, 0.0  ;;  %1746 = vmatprep.mubr.msk.f32.mxu0 %vm561_vm0, %v864_v62 }
 0x235   : > { %1747 = vmatmul.mubr.msk.f32.gmra.mrb[20].mxu0 %vm561_vm0, %v865_v35 }
 0x236   : > { %1749 = vmatprep.mubr.msk.f32.mxu0 %vm561_vm0, %v866_v0 }
 0x237   : > { %v1718_v2 = vpop.f32.mrb[8].mxu1 }
 0x238   : > { %v829_v3 = vpop.f32.mrb[9].mxu1  ;;  %v870_v10 = vmax.f32 %v1718_v2, 0.0 }
 0x239   : > { %v868_v4 = vmax.f32 %v829_v3, 0.0  ;;  %v1719_v6 = vpop.f32.mrb[10].mxu1  ;;  %1750 = vmatmul.mubr.msk.f32.gmra.mrb[22].mxu0 %vm561_vm0, %v867_v1 }
 0x23a   : > { %v832_v7 = vpop.f32.mrb[11].mxu1  ;;  %v871_v12 = vmax.f32 %v1719_v6, 0.0 }
 0x23b   : > { %v869_v8 = vmax.f32 %v832_v7, 0.0  ;;  %1752 = vmatprep.mubr.msk.f32.mxu0 %vm561_vm0, %v868_v4 }
 0x23d   : > { %1753 = vmatmul.mubr.msk.f32.gmra.mrb[24].mxu0 %vm561_vm0, %v869_v8 }
 0x23e   : > { %1755 = vmatprep.mubr.msk.f32.mxu0 %vm561_vm0, %v870_v10 }
 0x23f   : > { %v1722_v36 = vpop.f32.mrb[12].mxu1 }
 0x240   : > { %v845_v13 = vpop.f32.mrb[13].mxu1  ;;  %v874_v17 = vmax.f32 %v1722_v36, 0.0 }
 0x241   : > { %v872_v46 = vmax.f32 %v845_v13, 0.0  ;;  %v1723_v14 = vpop.f32.mrb[14].mxu1  ;;  %1756 = vmatmul.mubr.msk.f32.gmra.mrb[26].mxu0 %vm561_vm0, %v871_v12 }
 0x242   : > { %v848_v15 = vpop.f32.mrb[15].mxu1  ;;  %v875_v57 = vmax.f32 %v1723_v14, 0.0 }
 0x243   : > { %v873_v16 = vmax.f32 %v848_v15, 0.0  ;;  %1758 = vmatprep.mubr.msk.f32.mxu0 %vm561_vm0, %v872_v46 }
 0x245   : > { %1759 = vmatmul.mubr.msk.f32.gmra.mrb[28].mxu0 %vm561_vm0, %v873_v16 }
 0x246   : > { %1761 = vmatprep.mubr.msk.f32.mxu0 %vm561_vm0, %v874_v17 }
 0x249   : > { %1762 = vmatmul.mubr.msk.f32.gmra.mrb[30].mxu0 %vm561_vm0, %v875_v57 }
 0x24a   : > { %1780 = vmatprep.mubr.bf16.mxu0 %v2298_v19 }
 0x300   : > { %v1742_v20 = vpop.f32.mrb[16].mxu0 }
 0x301   : > { %v998_v21 = vpop.f32.mrb[17].mxu0 }
 0x302   : > { %v1077_v22 = vpack.c.bf16 %v1742_v20, %v998_v21 }
 0x304   : > { %v1745_v23 = vpop.f32.mrb[18].mxu0  ;;  %1764 = vmatprep.subr.bf16.mxu0 %v1077_v22  ;;  %1828 = vmatprep.subr.bf16.mxu1 %v1077_v22 }
 0x305   : > { %v1008_v24 = vpop.f32.mrb[19].mxu0  ;;  %1765 = vmatpush3.bf16.msra.mxu0 %v1077_v22  ;;  %1836 = vmatpush3.bf16.msra.mxu1 %v1077_v22 }
 0x306   : > { %v1078_v25 = vpack.c.bf16 %v1745_v23, %v1008_v24 }
 0x308   : > { %v1748_v26 = vpop.f32.mrb[20].mxu0  ;;  %1766 = vmatprep.subr.bf16.mxu0 %v1078_v25  ;;  %1829 = vmatprep.subr.bf16.mxu1 %v1078_v25 }
 0x309   : > { %v1018_v27 = vpop.f32.mrb[21].mxu0  ;;  %1767 = vmatpush3.bf16.msra.mxu0 %v1078_v25  ;;  %1837 = vmatpush3.bf16.msra.mxu1 %v1078_v25 }
 0x30a   : > { %v1079_v28 = vpack.c.bf16 %v1748_v26, %v1018_v27 }
 0x30c   : > { %v1751_v29 = vpop.f32.mrb[22].mxu0  ;;  %1768 = vmatprep.subr.bf16.mxu0 %v1079_v28  ;;  %1830 = vmatprep.subr.bf16.mxu1 %v1079_v28 }
 0x30d   : > { %v1028_v19 = vpop.f32.mrb[23].mxu0  ;;  %1769 = vmatpush3.bf16.msra.mxu0 %v1079_v28  ;;  %1838 = vmatpush3.bf16.msra.mxu1 %v1079_v28 }
 0x30e   : > { %v1080_v30 = vpack.c.bf16 %v1751_v29, %v1028_v19 }
 0x310   : > { %v1754_v31 = vpop.f32.mrb[24].mxu0  ;;  %1770 = vmatprep.subr.bf16.mxu0 %v1080_v30  ;;  %1831 = vmatprep.subr.bf16.mxu1 %v1080_v30 }
 0x311   : > { %v1038_v32 = vpop.f32.mrb[25].mxu0  ;;  %1771 = vmatpush3.bf16.msra.mxu0 %v1080_v30  ;;  %1839 = vmatpush3.bf16.msra.mxu1 %v1080_v30 }
 0x312   : > { %v1081_v33 = vpack.c.bf16 %v1754_v31, %v1038_v32 }
 0x314   : > { %v1757_v34 = vpop.f32.mrb[26].mxu0  ;;  %1772 = vmatprep.subr.bf16.mxu0 %v1081_v33  ;;  %1832 = vmatprep.subr.bf16.mxu1 %v1081_v33 }
 0x315   : > { %v1048_v38 = vpop.f32.mrb[27].mxu0  ;;  %1773 = vmatpush3.bf16.msra.mxu0 %v1081_v33  ;;  %1840 = vmatpush3.bf16.msra.mxu1 %v1081_v33 }
 0x316   : > { %v1082_v39 = vpack.c.bf16 %v1757_v34, %v1048_v38 }
 0x318   : > { %v1760_v40 = vpop.f32.mrb[28].mxu0  ;;  %1774 = vmatprep.subr.bf16.mxu0 %v1082_v39  ;;  %1833 = vmatprep.subr.bf16.mxu1 %v1082_v39 }
 0x319   : > { %v1058_v41 = vpop.f32.mrb[29].mxu0  ;;  %1775 = vmatpush3.bf16.msra.mxu0 %v1082_v39  ;;  %1841 = vmatpush3.bf16.msra.mxu1 %v1082_v39 }
 0x31a   : > { %v1083_v43 = vpack.c.bf16 %v1760_v40, %v1058_v41 }
 0x31c   : > { %v1763_v45 = vpop.f32.mrb[30].mxu0  ;;  %1776 = vmatprep.subr.bf16.mxu0 %v1083_v43  ;;  %1834 = vmatprep.subr.bf16.mxu1 %v1083_v43 }
 0x31d   : > { %v1068_v47 = vpop.f32.mrb[31].mxu0  ;;  %1777 = vmatpush3.bf16.msra.mxu0 %v1083_v43  ;;  %1842 = vmatpush3.bf16.msra.mxu1 %v1083_v43 }
 0x31e   : > { %v1084_v48 = vpack.c.bf16 %v1763_v45, %v1068_v47 }
 0x320   : > { %1778 = vmatprep.subr.bf16.mxu0 %v1084_v48  ;;  %1835 = vmatprep.subr.bf16.mxu1 %v1084_v48 }
 0x321   : > { %1779 = vmatpush3.bf16.msra.mxu0 %v1084_v48  ;;  %1843 = vmatpush3.bf16.msra.mxu1 %v1084_v48 }
 0x324   : > { %1785 = vmatmul.mubr.bf16.vlgmr.msra.gmra.mrb[16].mxu1 %v2340_v42  ;;  %1781 = vmatmul.mubr.bf16.vlgmr.msra.gmra.mrb[32].mxu0 %v2310_v44 }
 0x325   : > { %1788 = vmatprep.mubr.bf16.mxu1 %v2354_v9 }
 0x32c   : > { %1789 = vmatmul.mubr.bf16.gmra.mrb[20].mxu1 %v2367_v37 }
 0x32d   : > { %1792 = vmatprep.mubr.bf16.mxu1 %v2391_v5 }
 0x334   : > { %1793 = vmatmul.mubr.bf16.gmra.mrb[24].mxu1 %v2406_v18 }
 0x3f7   : > { %v1786_v49 = vpop.f32.mrb[16].mxu1  ;;  %v1782_v50 = vpop.f32.mrb[32].mxu0 }
 0x3f8   : > { %1188 = vst [vmem:[%s2440_s17 + $0x30] sm:$0xff] %v1786_v49  ;;  %v1135_v44 = vpop.f32.mrb[17].mxu1  ;;  %1184 = vst [vmem:[%s2440_s17 + $0x10] sm:$0xff] %v1782_v50  ;;  %v1119_v42 = vpop.f32.mrb[33].mxu0 }
 0x3f9   : > { %1186 = vst [vmem:[%s2440_s17 + $0x20] sm:$0xff] %v1135_v44  ;;  %v1787_v9 = vpop.f32.mrb[18].mxu1  ;;  %1182 = vst [vmem:[%s2440_s17] sm:$0xff] %v1119_v42  ;;  %v1783_v37 = vpop.f32.mrb[34].mxu0 }
 0x3fa   : > { %1189 = vst [vmem:[%s2440_s17 + $0x38] sm:$0xff] %v1787_v9  ;;  %v1138_v5 = vpop.f32.mrb[19].mxu1  ;;  %1185 = vst [vmem:[%s2440_s17 + $0x18] sm:$0xff] %v1783_v37  ;;  %v1122_v18 = vpop.f32.mrb[35].mxu0 }
 0x3fb   : > { %1187 = vst [vmem:[%s2440_s17 + $0x28] sm:$0xff] %v1138_v5  ;;  %1183 = vst [vmem:[%s2440_s17 + $0x8] sm:$0xff] %v1122_v18 }
 0x3ff   : > { %v1790_v51 = vpop.f32.mrb[20].mxu1 }
 0x400   : > { %1192 = vst [vmem:[%s2440_s17 + $0x50] sm:$0xff] %v1790_v51  ;;  %v1151_v52 = vpop.f32.mrb[21].mxu1 }
 0x401   : > { %1190 = vst [vmem:[%s2440_s17 + $0x40] sm:$0xff] %v1151_v52  ;;  %v1791_v53 = vpop.f32.mrb[22].mxu1 }
 0x402   : > { %1193 = vst [vmem:[%s2440_s17 + $0x58] sm:$0xff] %v1791_v53  ;;  %v1154_v54 = vpop.f32.mrb[23].mxu1 }
 0x403   : > { %1191 = vst [vmem:[%s2440_s17 + $0x48] sm:$0xff] %v1154_v54 }
 0x407   : > { %v1794_v55 = vpop.f32.mrb[24].mxu1 }
 0x408   : > { %1196 = vst [vmem:[%s2440_s17 + $0x70] sm:$0xff] %v1794_v55  ;;  %v1167_v56 = vpop.f32.mrb[25].mxu1 }
 0x409   : > { %1194 = vst [vmem:[%s2440_s17 + $0x60] sm:$0xff] %v1167_v56  ;;  %v1795_v58 = vpop.f32.mrb[26].mxu1 }
 0x40a   : > { %1197 = vst [vmem:[%s2440_s17 + $0x78] sm:$0xff] %v1795_v58  ;;  %v1170_v59 = vpop.f32.mrb[27].mxu1 }
 0x40b   : > { %1195 = vst [vmem:[%s2440_s17 + $0x68] sm:$0xff] %v1170_v59 }
 0x40c   : > { %1963 = shalt.err (!%p1960_p0)
}
 0x40d   : > { %s1964_s26 = scalar_lea.hbm %s2460_s8, 2048  ;;  %s1968_s10 = scalar_lea.hbm %s2514_s5, 4096 }
 0x40e   : > { %p1965_p2 = scmp.ne.s32.totalorder %s2460_s8, %s1964_s26  ;;  %p1969_p12 = scmp.lt.u32.totalorder %s2460_s8, %s2514_s5 }
 0x40f   : > { %p1970_p6 = scmp.lt.u32.totalorder %s1968_s10, %s1964_s26  ;;  %p1972_p3 = scmp.lt.u32.totalorder %s1964_s26, %s2460_s8 }
 0x410   : > { %p1966_p7 = pnand %p1965_p2, %p2528_p8 }
 0x411   : > { %p1971_p13 = por %p1970_p6, %p1969_p12 }
 0x412   : > { %p1967_p5 = pneg %p1966_p7 }
 0x413   : > { %p1973_p9 = por %p1972_p3, %p1971_p13 }
 0x415   : > { %p1974_p10 = pnand %p1973_p9, %p1967_p5 }
 0x417   : > { %1977 = shalt.err (!%p1974_p10)
}
 0x418   : > { %s2027_s16 = smov 128   ;;  %s2028_s13 = smov 8  }
 0x419   : > { %1850 = dma.vmem_to_hbm [thread:$0]  (%p2528_p8), %s2462_s7, 2048, %s2460_s8, %s1199_s22, %s2027_s16, %s2027_s16, %s2028_s13  }
 0x41a PF: > { %s1227_s25 = sand.u32 1, %s2008_s18   ;;  %p2529_p1 = scmp.ne.s32.totalorder %s2521_s6, 0 }
 0x41b   : > { %p2530_p4 = scmp.ge.s32.totalorder %s2020_s21, 2  ;;  %s1228_s9 = scalar_lea.sflag [#allocation4], %s1227_s25 }
 0x41d   : > { %p1861_p11 = pnand %p2530_p4, %p2529_p1 }
 0x41f   : > { %2003 = dma.done.wait (!%p1861_p11), %s1228_s9, 2048  }
 0x420   : > { %2005 = vsyncadd (!%p1861_p11), %s1228_s9, 4294965248  ;;  %p19_p0 = scmp.ge.s32.totalorder %s2084_s24, 4   ;;  %s2531_s18 = smov %s2012_s19 }
 0x421   : > { %s2532_s19 = smov %s2016_s20  ;;  %s2533_s20 = smov %s2096_s27 }
 0x422   : > { %s2534_s21 = smov %s2084_s24  ;;  %21 = sbr.rel (!%p19_p0) target bundleno = 6 (0x6), region = 96 }
 0x429   :  { %1233 = vsyncpa [#allocation3], 1 }
 0x42a   :  { %1235 = vsyncpa [#allocation3 + $0x1], 1 }
 0x42b   :  { %1236 = vsyncpa [#allocation4], 1 }
 0x42c   :  { %1238 = vsyncpa [#allocation4 + $0x1], 1 }
 0x42d   :  { %1239 = vsyncpa [#allocation5], 1 }
 0x42e   :  { %1241 = vsyncpa [#allocation5 + $0x1], 1 }

</bundles_post_ra>
